<compile_context>
chip_gen: v7x
topology: tpu7x:2x2x1
jax: 0.10.0
libtpu: 0.0.40
codegen_flags: <defaults>
</compile_context>

<pallas_src>
import jax
import jax.numpy as jnp
from jax import lax
from jax.experimental import pallas as pl
from jax.experimental.pallas import tpu as pltpu

_LANES = 128
_SUBLANES = 8
# 2048*128*4B = 1 MiB per input block; 2 inputs x 2 pipeline buffers = 4 MiB,
# comfortably inside the default scoped-VMEM limit on v5e/v6e/v7x.
_MAX_BLOCK_ROWS = 2048


def _make_max_kernel(block_rows, n_valid, needs_mask):
    """Pass 1: per-block partial max of (pred - gt).

    Writes a (1, 8, 128) partial tile: per-lane max in sublane 0, -inf elsewhere.
    """

    def kernel(p_ref, g_ref, out_ref):
        p = p_ref[...].astype(jnp.float32)
        g = g_ref[...].astype(jnp.float32)
        d = p - g
        if needs_mask:
            i = pl.program_id(0)
            row = lax.broadcasted_iota(jnp.int32, d.shape, 0) + i * block_rows
            lane = lax.broadcasted_iota(jnp.int32, d.shape, 1)
            valid = (row * _LANES + lane) < n_valid
            d = jnp.where(valid, d, -jnp.inf)
        part = jnp.max(d, axis=0, keepdims=True)  # (1, 128) per-lane max
        sub = lax.broadcasted_iota(jnp.int32, (_SUBLANES, _LANES), 0)
        out_ref[0] = jnp.where(sub == 0, part, -jnp.inf)

    return kernel


def _make_sums_kernel(block_rows, n_valid, needs_mask, threshold):
    """Pass 2: per-block partial [sum|d|, sum_{d>c} d^2, count(d>c)].

    huber_c = threshold * max_diff is computed in-kernel from the (1,) SMEM scalar.
    Each partial is a (1, 8, 128) tile: values in sublane 0, zeros elsewhere.
    """

    def kernel(m_ref, p_ref, g_ref, abs_ref, sq_ref, cnt_ref):
        huber_c = m_ref[0] * jnp.float32(threshold)
        p = p_ref[...].astype(jnp.float32)
        g = g_ref[...].astype(jnp.float32)
        d = jnp.abs(p - g)
        if needs_mask:
            i = pl.program_id(0)
            row = lax.broadcasted_iota(jnp.int32, d.shape, 0) + i * block_rows
            lane = lax.broadcasted_iota(jnp.int32, d.shape, 1)
            valid = (row * _LANES + lane) < n_valid
            hmask = jnp.logical_and(d > huber_c, valid)
            d_abs = jnp.where(valid, d, 0.0)
        else:
            hmask = d > huber_c
            d_abs = d

        s_abs = jnp.sum(d_abs, axis=0, keepdims=True)                        # (1,128)
        s_sq = jnp.sum(jnp.where(hmask, d * d, 0.0), axis=0, keepdims=True)  # (1,128)
        s_cnt = jnp.sum(hmask.astype(jnp.float32), axis=0, keepdims=True)    # (1,128)

        sub = lax.broadcasted_iota(jnp.int32, (_SUBLANES, _LANES), 0)
        abs_ref[0] = jnp.where(sub == 0, s_abs, 0.0)
        sq_ref[0] = jnp.where(sub == 0, s_sq, 0.0)
        cnt_ref[0] = jnp.where(sub == 0, s_cnt, 0.0)

    return kernel


def berhu_loss(pred, gt, threshold=0.2, block_rows=_MAX_BLOCK_ROWS):
    assert pred.shape == gt.shape
    n = pred.size  # static

    p = pred.reshape(-1)
    g = gt.reshape(-1)

    # Pad only to a lane multiple (<=127 elements); validity handled in-kernel.
    pad = (-n) % _LANES
    if pad:
        p = jnp.pad(p, (0, pad))
        g = jnp.pad(g, (0, pad))
    rows = (n + pad) // _LANES
    p2 = p.reshape(rows, _LANES)
    g2 = g.reshape(rows, _LANES)

    block_rows = min(block_rows, rows)
    num_blocks = pl.cdiv(rows, block_rows)
    # Mask needed if there is lane padding or a partial tail grid block.
    needs_mask = (pad != 0) or (rows % block_rows != 0)

    tile_spec = pl.BlockSpec((block_rows, _LANES), lambda i: (i, 0))
    part_spec = pl.BlockSpec((1, _SUBLANES, _LANES), lambda i: (i, 0, 0))
    part_shape = jax.ShapeDtypeStruct((num_blocks, _SUBLANES, _LANES), jnp.float32)
    params = pltpu.CompilerParams(dimension_semantics=("parallel",))

    # Pass 1: per-block partial max of (pred - gt); final reduce is a tiny XLA op.
    max_part = pl.pallas_call(
        _make_max_kernel(block_rows, n, needs_mask),
        out_shape=part_shape,
        grid=(num_blocks,),
        in_specs=[tile_spec, tile_spec],
        out_specs=part_spec,
        compiler_params=params,
    )(p2, g2)
    max_diff = jnp.max(max_part).reshape(1)  # (1,) f32; threshold applied in-kernel

    # Pass 2: per-block partial sums / counts.
    abs_p, sq_p, cnt_p = pl.pallas_call(
        _make_sums_kernel(block_rows, n, needs_mask, threshold),
        out_shape=(part_shape, part_shape, part_shape),
        grid=(num_blocks,),
        in_specs=[pl.BlockSpec(memory_space=pltpu.SMEM), tile_spec, tile_spec],
        out_specs=(part_spec, part_spec, part_spec),
        compiler_params=params,
    )(max_diff, p2, g2)

    # mean over concat(diff, diff2): (N + count) elements.
    return (jnp.sum(abs_p) + jnp.sum(sq_p)) / (jnp.float32(n) + jnp.sum(cnt_p))


def _berhu_ref(pred, gt, threshold=0.2):
    """Pure-JAX reference with the same semantics."""
    d = jnp.abs(pred - gt)
    c = threshold * jnp.max(pred - gt)
    m = d > c
    return (jnp.sum(d) + jnp.sum(jnp.where(m, d * d, 0.0))) / (
        jnp.float32(d.size) + jnp.sum(m.astype(jnp.float32))
    )


if __name__ == "__main__":
    key = jax.random.PRNGKey(0)
    k1, k2, k3, k4 = jax.random.split(key, 4)

    # Case 1: canonical [B,1,H,W] inverse-depth maps (lane-aligned element count).
    B, C, H, W = 2, 1, 16, 16
    pred = jax.random.uniform(k1, (B, C, H, W), dtype=jnp.float32)
    gt = jax.random.uniform(k2, (B, C, H, W), dtype=jnp.float32)
    loss = berhu_loss(pred, gt, threshold=0.2)
    jax.block_until_ready(loss)
    ref = _berhu_ref(pred, gt, threshold=0.2)
    assert jnp.allclose(loss, ref, rtol=1e-5, atol=1e-6), (loss, ref)

    # Case 2: unaligned element count (exercises in-kernel tail masking).
    pred2 = jax.random.uniform(k3, (1, 1, 7, 13), dtype=jnp.float32)
    gt2 = jax.random.uniform(k4, (1, 1, 7, 13), dtype=jnp.float32)
    loss2 = berhu_loss(pred2, gt2, threshold=0.2)
    jax.block_until_ready(loss2)
    ref2 = _berhu_ref(pred2, gt2, threshold=0.2)
    assert jnp.allclose(loss2, ref2, rtol=1e-5, atol=1e-6), (loss2, ref2)

    # Case 3: multi-block grid with a partial tail block (small block override).
    pred3 = jax.random.uniform(k1, (2, 1, 16, 40), dtype=jnp.float32)
    gt3 = jax.random.uniform(k2, (2, 1, 16, 40), dtype=jnp.float32)
    loss3 = berhu_loss(pred3, gt3, threshold=0.2, block_rows=8)
    jax.block_until_ready(loss3)
    ref3 = _berhu_ref(pred3, gt3, threshold=0.2)
    assert jnp.allclose(loss3, ref3, rtol=1e-5, atol=1e-6), (loss3, ref3)

    print("KERNEL_OK")
</pallas_src>

<mosaic_0001>
module attributes {stable_mosaic.version = 11 : i64} {
  func.func @kernel(%arg0: i32, %arg1: memref<4x128xf32, #tpu.memory_space<vmem>>, %arg2: memref<4x128xf32, #tpu.memory_space<vmem>>, %arg3: memref<1x8x128xf32, #tpu.memory_space<vmem>>) attributes {dimension_semantics = [#tpu.dimension_semantics<parallel>], iteration_bounds = array<i64: 1>, scalar_prefetch = 0 : i64, scratch_operands = 0 : i64, tpu.core_type = #tpu.core_type<tc>, window_params = [{transform_indices = @transform_0, window_bounds = array<i64: 4, 128>}, {transform_indices = @transform_1, window_bounds = array<i64: 4, 128>}, {transform_indices = @transform_2, window_bounds = array<i64: 1, 8, 128>}]} {
    %c0 = arith.constant 0 : index
    %c0_0 = arith.constant 0 : index
    %0 = vector.load %arg1[%c0, %c0_0] : memref<4x128xf32, #tpu.memory_space<vmem>>, vector<4x128xf32>
    %c0_1 = arith.constant 0 : index
    %c0_2 = arith.constant 0 : index
    %1 = vector.load %arg2[%c0_1, %c0_2] : memref<4x128xf32, #tpu.memory_space<vmem>>, vector<4x128xf32>
    %2 = arith.subf %0, %1 : vector<4x128xf32>
    %cst = arith.constant dense<0xFF800000> : vector<128xf32>
    %3 = vector.multi_reduction <maximumf>, %2, %cst [0] : vector<4x128xf32> to vector<128xf32>
    %4 = vector.shape_cast %3 : vector<128xf32> to vector<1x128xf32>
    %5 = tpu.iota {dimensions = array<i32: 0>} : vector<8x128xi32>
    %c0_i32 = arith.constant 0 : i32
    %6 = vector.broadcast %c0_i32 : i32 to vector<8x128xi32>
    %7 = arith.cmpi eq, %5, %6 : vector<8x128xi32>
    %cst_3 = arith.constant 0xFF800000 : f32
    %8 = vector.shape_cast %4 : vector<1x128xf32> to vector<1x128xf32>
    %9 = vector.broadcast %8 : vector<1x128xf32> to vector<8x128xf32>
    %10 = vector.broadcast %cst_3 : f32 to vector<8x128xf32>
    %11 = arith.select %7, %9, %10 : vector<8x128xi1>, vector<8x128xf32>
    %c0_4 = arith.constant 0 : index
    %c0_5 = arith.constant 0 : index
    %c0_6 = arith.constant 0 : index
    %12 = vector.load %arg3[%c0_4, %c0_5, %c0_6] : memref<1x8x128xf32, #tpu.memory_space<vmem>>, vector<1x8x128xf32>
    %13 = vector.shape_cast %12 : vector<1x8x128xf32> to vector<8x128xf32>
    %14 = vector.shape_cast %11 : vector<8x128xf32> to vector<1x8x128xf32>
    tpu.vector_store %arg3[%c0_4, %c0_5, %c0_6], %14 {strides = array<i32>} : memref<1x8x128xf32, #tpu.memory_space<vmem>>, vector<1x8x128xf32>,
    return
  }
  func.func @transform_0(%arg0: i32) -> (i32, i32) {
    %c0_i32 = arith.constant 0 : i32
    %c0_i32_0 = arith.constant 0 : i32
    return %arg0, %c0_i32 : i32, i32
  }
  func.func @transform_1(%arg0: i32) -> (i32, i32) {
    %c0_i32 = arith.constant 0 : i32
    %c0_i32_0 = arith.constant 0 : i32
    return %arg0, %c0_i32 : i32, i32
  }
  func.func @transform_2(%arg0: i32) -> (i32, i32, i32) {
    %c0_i32 = arith.constant 0 : i32
    %c0_i32_0 = arith.constant 0 : i32
    %c0_i32_1 = arith.constant 0 : i32
    return %arg0, %c0_i32, %c0_i32_0 : i32, i32, i32
  }
}

</mosaic_0001>

<bundles_post_ra>
// kernel: tpu_custom_call.1
= control target key start
LH: loop header
LB: loop body
LE: loop exit
PB: predicated region body
PF: predicated region fallthrough
CT: control target
= control target key end

     0   :  { %7 = vsyncpa [#allocation3], 0  ;;  %s197_s0 = inlined_call_operand.hbm [shape: f32[4,128], index: 0, kind: input, shape index: {}]   ;;  %s198_s1 = inlined_call_operand.hbm [shape: f32[4,128], index: 1, kind: input, shape index: {}]   ;;  %s199_s2 = inlined_call_operand.hbm [shape: f32[1,8,128], index: 2, kind: output, shape index: {}]  }
   0x1   :  { %8 = vsyncpa [#allocation6], 0 }
   0x2   :  { %9 = vsyncpa [#allocation4], 0  ;;  %s143_s9 = smov [#allocation2]   ;;  %s144_s11 = smov [#allocation5]  }
   0x3   :  { %s16_s10 = sshll.u32 %s143_s9, 4  ;;  %s26_s12 = sshll.u32 %s144_s11, 4  ;;  %s17_s10 = int_to_ptr.vmem [resolvable:$true] %s16_s10  ;;  %s27_s12 = int_to_ptr.vmem [resolvable:$true] %s26_s12 }
   0x4   :  { %s71_s15 = scalar_lea.hbm %s197_s0, 64 }
   0x5   :  { %p72_p0 = scmp.ne.s32.totalorder %s197_s0, %s71_s15  ;;  %p75_p1 = scmp.lt.u32.totalorder %s71_s15, %s197_s0 }
   0x7   :  { %p77_p2 = pnand %p75_p1, %p72_p0 }
   0x9   :  { %80 = shalt.err (!%p77_p2)
}
   0xa   :  { %s81_s20 = scalar_lea.vmem %s17_s10, 64  ;;  %p86_p4 = scmp.lt.s32.totalorder %s17_s10, %s17_s10 }
   0xb   :  { %p82_p3 = scmp.ne.s32.totalorder %s17_s10, %s81_s20  ;;  %p87_p5 = scmp.lt.s32.totalorder %s81_s20, %s81_s20 }
   0xd   :  { %p88_p6 = por %p87_p5, %p86_p4 }
   0xf   :  { %p89_p7 = pnand %p88_p6, %p82_p3 }
  0x11   :  { %92 = shalt.err (!%p89_p7)
}
  0x12   :  { %19 = dma.hbm_to_vmem [thread:$0]  %s197_s0, 64, %s17_s10, [#allocation3]  }
  0x13   :  { %s93_s25 = scalar_lea.hbm %s198_s1, 64 }
  0x14   :  { %p94_p8 = scmp.ne.s32.totalorder %s198_s1, %s93_s25  ;;  %p97_p9 = scmp.lt.u32.totalorder %s93_s25, %s198_s1 }
  0x16   :  { %p99_p10 = pnand %p97_p9, %p94_p8 }
  0x18   :  { %102 = shalt.err (!%p99_p10)
}
  0x19   :  { %s103_s30 = scalar_lea.vmem %s27_s12, 64  ;;  %p108_p12 = scmp.lt.s32.totalorder %s27_s12, %s27_s12 }
  0x1a   :  { %p104_p11 = scmp.ne.s32.totalorder %s27_s12, %s103_s30  ;;  %p109_p13 = scmp.lt.s32.totalorder %s103_s30, %s103_s30 }
  0x1c   :  { %p110_p0 = por %p109_p13, %p108_p12 }
  0x1e   :  { %p111_p1 = pnand %p110_p0, %p104_p11 }
  0x20   :  { %114 = shalt.err (!%p111_p1)
}
  0x21   :  { %29 = dma.hbm_to_vmem [thread:$0]  %s198_s1, 64, %s27_s12, [#allocation6]  }
  0x22   :  { %137 = dma.done.wait [#allocation3], 64  }
  0x23   :  { %138 = vsyncadd [#allocation3], 4294967232 }
  0x24   :  { %139 = dma.done.wait [#allocation6], 64  }
  0x25   :  { %140 = vsyncadd [#allocation6], 4294967232  ;;  %v36_v0 = vld [vmem:[#allocation2] sm:$0xf]  ;;  %v37_v1 = vld [vmem:[#allocation5] sm:$0xf]  ;;  %v47_v5 = vlaneseq }
  0x26   :  { %vm39_vm0 = vcmask 1043456   ;;  %v38_v2 = vsub.f32 %v36_v0, %v37_v1  ;;  %s145_s4 = smov [#allocation7]  }
  0x27   :  { %v48_v8 = vshrl.u32 %v47_v5, 7  ;;  %s58_s5 = sshll.u32 %s145_s4, 4  ;;  %s59_s5 = int_to_ptr.vmem [resolvable:$true] %s58_s5 }
  0x28   :  { %v40_v3 = vsel %vm39_vm0, %v38_v2, -inf  ;;  %s115_s1 = scalar_lea.vmem %s59_s5, 128  ;;  %p120_p3 = scmp.lt.s32.totalorder %s59_s5, %s59_s5 }
  0x29   :  { %v41_v4 = vrot.slane %v40_v3, 4  ;;  %vm49_vm1 = vcmp.eq.s32.totalorder %v48_v8, 0  ;;  %p116_p2 = scmp.ne.s32.totalorder %s59_s5, %s115_s1  ;;  %p121_p4 = scmp.lt.s32.totalorder %s115_s1, %s115_s1 }
  0x2b   :  { %v42_v6 = vmax.f32 %v40_v3, %v41_v4  ;;  %p122_p5 = por %p121_p4, %p120_p3 }
  0x2d   :  { %v43_v7 = vrot.slane %v42_v6, 2  ;;  %p123_p6 = pnand %p122_p5, %p116_p2 }
  0x2f   :  { %v44_v9 = vmax.f32 %v42_v6, %v43_v7 }
  0x31   :  { %v45_v10 = vrot.slane %v44_v9, 1 }
  0x33   :  { %v46_v11 = vmax.f32 %v44_v9, %v45_v10 }
  0x35   :  { %v50_v12 = vsel %vm49_vm1, %v46_v11, -inf }
  0x36   :  { %51 = vst [vmem:[#allocation7] sm:$0xff] %v50_v12 }
  0x37   :  { %126 = shalt.err (!%p123_p6)
}
  0x38   :  { %s127_s8 = scalar_lea.hbm %s199_s2, 128 }
  0x39   :  { %p128_p7 = scmp.ne.s32.totalorder %s199_s2, %s127_s8  ;;  %p131_p8 = scmp.lt.u32.totalorder %s127_s8, %s199_s2 }
  0x3b   :  { %p133_p9 = pnand %p131_p8, %p128_p7 }
  0x3d   :  { %136 = shalt.err (!%p133_p9)
}
  0x3e   :  { %61 = dma.vmem_to_hbm [thread:$0]  %s59_s5, 128, %s199_s2, [#allocation4]  }
  0x3f   :  { %141 = dma.done.wait [#allocation4], 128  }
  0x40   :  { %142 = vsyncadd [#allocation4], 4294967168 }
  0x41   :  { %65 = vsyncpa [#allocation3], 1 }
  0x42   :  { %66 = vsyncpa [#allocation6], 1 }
  0x43   :  { %67 = vsyncpa [#allocation4], 1 }

</bundles_post_ra>
